<compile_context>
chip_gen: v7x
topology: tpu7x:2x2x1
jax: 0.10.0
libtpu: 0.0.40
codegen_flags: <defaults>
</compile_context>

<pallas_src>
import functools

import jax
import jax.numpy as jnp
from jax.experimental import pallas as pl
from jax.experimental.pallas import tpu as pltpu

# MLP layer sizes from the PyTorch module's __init__.
LAYER_SIZES = [16, 64, 128, 64, 16, 1]


def _round_up(x, m):
    return ((x + m - 1) // m) * m


def _cbf_mlp_kernel(x_ref,
                    w1, b1, w2, b2, w3, b3, w4, b4, w5, b5, w6, b6,
                    o_ref, *, use_bf16):
    """Fused forward pass for one batch tile.

    Feature-major layout: x_ref is (obs_pad, tile) with batch on lanes; weights
    arrive as W^T = (out_features, in_features) and are fully VMEM-resident;
    biases are (out_features, 1) and broadcast across the lane (batch) axis.
    """
    h = x_ref[...]                                        # (obs_pad, tile) f32

    def layer(h, w_ref, b_ref):
        w = w_ref[...]                                    # (out, in), f32 or bf16
        rhs = h.astype(w.dtype) if use_bf16 else h
        return jnp.dot(w, rhs, preferred_element_type=jnp.float32) + b_ref[...]

    h = jnp.maximum(layer(h, w1, b1), 0.0)                # (16,  tile)
    h = jnp.maximum(layer(h, w2, b2), 0.0)                # (64,  tile)
    h = jnp.maximum(layer(h, w3, b3), 0.0)                # (128, tile)
    h = jnp.maximum(layer(h, w4, b4), 0.0)                # (64,  tile)
    h = jnp.maximum(layer(h, w5, b5), 0.0)                # (16,  tile)

    # Final 16 -> 1 layer as broadcast-multiply + sublane reduce (avoids an
    # M=1 matmul); the result is already lane-dense (1, tile).
    y = jnp.sum(h * w6[...], axis=0, keepdims=True) + b6[...]
    o_ref[...] = y.astype(o_ref.dtype)


def init_params(key, obs_dim):
    """Deterministic parameter init (shapes/semantics match the PyTorch module).

    Weights are stored (in_features, out_features) so y = x @ w + b.
    """
    dims = [obs_dim] + LAYER_SIZES
    params = []
    for i in range(len(dims) - 1):
        key, kw, kb = jax.random.split(key, 3)
        bound = 1.0 / jnp.sqrt(jnp.float32(dims[i]))
        w = jax.random.uniform(kw, (dims[i], dims[i + 1]),
                               minval=-bound, maxval=bound, dtype=jnp.float32)
        b = jax.random.uniform(kb, (1, dims[i + 1]),
                               minval=-bound, maxval=bound, dtype=jnp.float32)
        params.append((w, b))
    return params


@functools.partial(jax.jit, static_argnames=("batch_tile", "use_bf16"))
def cbf_forward(x, params, *, batch_tile=1024, use_bf16=False):
    """Fused MLP forward, tiled along the batch (lane) axis.

    batch_tile must be a multiple of 128. use_bf16=True pre-casts the weights
    to bf16 (v6e/v7x MXU operands, f32 accumulation); keep False on v5e or when
    f32-level accuracy is required.
    """
    batch, obs_dim = x.shape
    assert batch_tile % 128 == 0, "batch_tile must be a multiple of 128"

    obs_pad = _round_up(obs_dim, 8)

    # Tile selection: tiny batches -> one 128-wide tile; batches > 128 always
    # get >= 2 grid steps (v7x megacore), capped by batch_tile.
    padded128 = _round_up(batch, 128)
    if padded128 <= 128:
        eff_tile = 128
    else:
        eff_tile = min(batch_tile, _round_up((padded128 + 1) // 2, 128))
    padded_batch = _round_up(batch, eff_tile)
    num_tiles = padded_batch // eff_tile

    # Feature-major, zero-padded input: (obs_pad, padded_batch), batch on lanes.
    xt = jnp.zeros((obs_pad, padded_batch), x.dtype).at[:obs_dim, :batch].set(x.T)

    # Pack params once: W^T = (out, in) [layer 0 in-dim padded to obs_pad],
    # biases as (out, 1). Last layer stays as a (16, 1) column + (1, 1) bias for
    # the multiply-reduce path. Optionally pre-cast W^T (layers 1..5) to bf16.
    n_layers = len(params)
    flat = []
    flops = 0
    for li, (w, b) in enumerate(params):
        if li < n_layers - 1:
            wt = w.T                                       # (out, in)
            if li == 0 and wt.shape[1] != obs_pad:
                wt = jnp.zeros((wt.shape[0], obs_pad), wt.dtype).at[:, :w.shape[0]].set(wt)
            if use_bf16:
                wt = wt.astype(jnp.bfloat16)
            bt = b.T                                       # (out, 1)
            flops += 2 * padded_batch * wt.shape[0] * wt.shape[1]
        else:
            wt = w                                         # (16, 1) column, f32
            bt = b                                         # (1, 1)
            flops += 2 * padded_batch * w.shape[0]
        flat.extend([wt, bt])

    param_bytes = sum(int(p.size) * p.dtype.itemsize for p in flat)
    bytes_accessed = (padded_batch * obs_pad * 4           # x read
                      + param_bytes                        # weights/biases read
                      + padded_batch * 4)                  # lane-dense (1, B) output

    x_spec = pl.BlockSpec((obs_pad, eff_tile), lambda i: (0, i))
    # Full-array, constant-index param blocks: resident in VMEM, not re-fetched.
    param_specs = [pl.BlockSpec(p.shape, lambda i: (0, 0)) for p in flat]
    # Lane-dense (1, tile) output row per grid step.
    out_spec = pl.BlockSpec((1, eff_tile), lambda i: (0, i))

    out = pl.pallas_call(
        functools.partial(_cbf_mlp_kernel, use_bf16=use_bf16),
        out_shape=jax.ShapeDtypeStruct((1, padded_batch), jnp.float32),
        grid_spec=pltpu.PrefetchScalarGridSpec(
            num_scalar_prefetch=0,
            grid=(num_tiles,),
            in_specs=[x_spec] + param_specs,
            out_specs=out_spec,
        ),
        compiler_params=pltpu.CompilerParams(
            dimension_semantics=("parallel",)),
        cost_estimate=pl.CostEstimate(
            flops=flops, transcendentals=0, bytes_accessed=bytes_accessed),
    )(xt, *flat)

    # Drop batch padding; return (batch, 1) to match the PyTorch module.
    return out[:, :batch].T


def reference_forward(x, params):
    h = x
    for i, (w, b) in enumerate(params):
        h = h @ w + b
        if i < len(params) - 1:
            h = jnp.maximum(h, 0.0)
    return h


if __name__ == "__main__":
    key = jax.random.PRNGKey(0)
    key, kx, kx2 = jax.random.split(key, 3)

    obs_dim = 4   # observation dimension for the CBF model
    batch = 8     # small batch

    x = jax.random.normal(kx, (batch, obs_dim), dtype=jnp.float32)
    params = init_params(key, obs_dim)

    out = cbf_forward(x, params)
    out = jax.block_until_ready(out)
    ref = reference_forward(x, params)
    assert out.shape == (batch, 1), out.shape
    assert jnp.allclose(out, ref, atol=1e-5, rtol=1e-5), (
        "Pallas output does not match reference (small batch)")

    # Multi-tile / batch-padding path (grid >= 2).
    batch2 = 300
    x2 = jax.random.normal(kx2, (batch2, obs_dim), dtype=jnp.float32)
    out2 = cbf_forward(x2, params)
    out2 = jax.block_until_ready(out2)
    ref2 = reference_forward(x2, params)
    assert out2.shape == (batch2, 1), out2.shape
    assert jnp.allclose(out2, ref2, atol=1e-5, rtol=1e-5), (
        "Pallas output does not match reference (multi-tile batch)")

    # bf16 MXU-operand path (v6e/v7x), looser tolerance.
    out3 = cbf_forward(x2, params, use_bf16=True)
    out3 = jax.block_until_ready(out3)
    assert jnp.allclose(out3, ref2, atol=5e-2, rtol=5e-2), (
        "Pallas bf16 output diverges from f32 reference")

    print("KERNEL_OK")
</pallas_src>

<mosaic_0001>
module attributes {stable_mosaic.version = 11 : i64} {
  func.func @_cbf_mlp_kernel(%arg0: i32, %arg1: memref<8x128xf32, #tpu.memory_space<vmem>>, %arg2: memref<16x8xf32, #tpu.memory_space<vmem>>, %arg3: memref<16x1xf32, #tpu.memory_space<vmem>>, %arg4: memref<64x16xf32, #tpu.memory_space<vmem>>, %arg5: memref<64x1xf32, #tpu.memory_space<vmem>>, %arg6: memref<128x64xf32, #tpu.memory_space<vmem>>, %arg7: memref<128x1xf32, #tpu.memory_space<vmem>>, %arg8: memref<64x128xf32, #tpu.memory_space<vmem>>, %arg9: memref<64x1xf32, #tpu.memory_space<vmem>>, %arg10: memref<16x64xf32, #tpu.memory_space<vmem>>, %arg11: memref<16x1xf32, #tpu.memory_space<vmem>>, %arg12: memref<16x1xf32, #tpu.memory_space<vmem>>, %arg13: memref<1x1xf32, #tpu.memory_space<vmem>>, %arg14: memref<1x128xf32, #tpu.memory_space<vmem>>) attributes {dimension_semantics = [#tpu.dimension_semantics<parallel>], iteration_bounds = array<i64: 1>, scalar_prefetch = 0 : i64, scratch_operands = 0 : i64, tpu.core_type = #tpu.core_type<tc>, window_params = [{transform_indices = @transform_0, window_bounds = array<i64: 8, 128>}, {pipeline_mode = #tpu.pipeline_mode<synchronous>, transform_indices = @transform_1, window_bounds = array<i64: 16, 8>}, {pipeline_mode = #tpu.pipeline_mode<synchronous>, transform_indices = @transform_2, window_bounds = array<i64: 16, 1>}, {pipeline_mode = #tpu.pipeline_mode<synchronous>, transform_indices = @transform_3, window_bounds = array<i64: 64, 16>}, {pipeline_mode = #tpu.pipeline_mode<synchronous>, transform_indices = @transform_4, window_bounds = array<i64: 64, 1>}, {pipeline_mode = #tpu.pipeline_mode<synchronous>, transform_indices = @transform_5, window_bounds = array<i64: 128, 64>}, {pipeline_mode = #tpu.pipeline_mode<synchronous>, transform_indices = @transform_6, window_bounds = array<i64: 128, 1>}, {pipeline_mode = #tpu.pipeline_mode<synchronous>, transform_indices = @transform_7, window_bounds = array<i64: 64, 128>}, {pipeline_mode = #tpu.pipeline_mode<synchronous>, transform_indices = @transform_8, window_bounds = array<i64: 64, 1>}, {pipeline_mode = #tpu.pipeline_mode<synchronous>, transform_indices = @transform_9, window_bounds = array<i64: 16, 64>}, {pipeline_mode = #tpu.pipeline_mode<synchronous>, transform_indices = @transform_10, window_bounds = array<i64: 16, 1>}, {pipeline_mode = #tpu.pipeline_mode<synchronous>, transform_indices = @transform_11, window_bounds = array<i64: 16, 1>}, {pipeline_mode = #tpu.pipeline_mode<synchronous>, transform_indices = @transform_12, window_bounds = array<i64: 1, 1>}, {transform_indices = @transform_13, window_bounds = array<i64: 1, 128>}]} {
    %c0 = arith.constant 0 : index
    %c0_0 = arith.constant 0 : index
    %0 = vector.load %arg1[%c0, %c0_0] : memref<8x128xf32, #tpu.memory_space<vmem>>, vector<8x128xf32>
    %c0_1 = arith.constant 0 : index
    %c0_2 = arith.constant 0 : index
    %1 = vector.load %arg2[%c0_1, %c0_2] : memref<16x8xf32, #tpu.memory_space<vmem>>, vector<16x8xf32>
    %cst = arith.constant dense<0.000000e+00> : vector<16x128xf32>
    %2 = tpu.matmul %1, %0, %cst {dimension_numbers = #tpu.dot_dimension_numbers<[1], [0], [0], [1], [0, 0, 1, 1], [], []>} : vector<16x8xf32>, vector<8x128xf32>, vector<16x128xf32> -> vector<16x128xf32>
    %c0_3 = arith.constant 0 : index
    %c0_4 = arith.constant 0 : index
    %3 = vector.load %arg3[%c0_3, %c0_4] : memref<16x1xf32, #tpu.memory_space<vmem>>, vector<16x1xf32>
    %4 = vector.broadcast %3 : vector<16x1xf32> to vector<16x128xf32>
    %5 = arith.addf %2, %4 : vector<16x128xf32>
    %cst_5 = arith.constant 0.000000e+00 : f32
    %6 = vector.broadcast %cst_5 : f32 to vector<16x128xf32>
    %7 = arith.maximumf %5, %6 : vector<16x128xf32>
    %c0_6 = arith.constant 0 : index
    %c0_7 = arith.constant 0 : index
    %8 = vector.load %arg4[%c0_6, %c0_7] : memref<64x16xf32, #tpu.memory_space<vmem>>, vector<64x16xf32>
    %cst_8 = arith.constant dense<0.000000e+00> : vector<64x128xf32>
    %9 = tpu.matmul %8, %7, %cst_8 {dimension_numbers = #tpu.dot_dimension_numbers<[1], [0], [0], [1], [0, 0, 1, 1], [], []>} : vector<64x16xf32>, vector<16x128xf32>, vector<64x128xf32> -> vector<64x128xf32>
    %c0_9 = arith.constant 0 : index
    %c0_10 = arith.constant 0 : index
    %10 = vector.load %arg5[%c0_9, %c0_10] : memref<64x1xf32, #tpu.memory_space<vmem>>, vector<64x1xf32>
    %11 = vector.broadcast %10 : vector<64x1xf32> to vector<64x128xf32>
    %12 = arith.addf %9, %11 : vector<64x128xf32>
    %cst_11 = arith.constant 0.000000e+00 : f32
    %13 = vector.broadcast %cst_11 : f32 to vector<64x128xf32>
    %14 = arith.maximumf %12, %13 : vector<64x128xf32>
    %c0_12 = arith.constant 0 : index
    %c0_13 = arith.constant 0 : index
    %15 = vector.load %arg6[%c0_12, %c0_13] : memref<128x64xf32, #tpu.memory_space<vmem>>, vector<128x64xf32>
    %cst_14 = arith.constant dense<0.000000e+00> : vector<128x128xf32>
    %16 = tpu.matmul %15, %14, %cst_14 {dimension_numbers = #tpu.dot_dimension_numbers<[1], [0], [0], [1], [0, 0, 1, 1], [], []>} : vector<128x64xf32>, vector<64x128xf32>, vector<128x128xf32> -> vector<128x128xf32>
    %c0_15 = arith.constant 0 : index
    %c0_16 = arith.constant 0 : index
    %17 = vector.load %arg7[%c0_15, %c0_16] : memref<128x1xf32, #tpu.memory_space<vmem>>, vector<128x1xf32>
    %18 = vector.broadcast %17 : vector<128x1xf32> to vector<128x128xf32>
    %19 = arith.addf %16, %18 : vector<128x128xf32>
    %cst_17 = arith.constant 0.000000e+00 : f32
    %20 = vector.broadcast %cst_17 : f32 to vector<128x128xf32>
    %21 = arith.maximumf %19, %20 : vector<128x128xf32>
    %c0_18 = arith.constant 0 : index
    %c0_19 = arith.constant 0 : index
    %22 = vector.load %arg8[%c0_18, %c0_19] : memref<64x128xf32, #tpu.memory_space<vmem>>, vector<64x128xf32>
    %cst_20 = arith.constant dense<0.000000e+00> : vector<64x128xf32>
    %23 = tpu.matmul %22, %21, %cst_20 {dimension_numbers = #tpu.dot_dimension_numbers<[1], [0], [0], [1], [0, 0, 1, 1], [], []>} : vector<64x128xf32>, vector<128x128xf32>, vector<64x128xf32> -> vector<64x128xf32>
    %c0_21 = arith.constant 0 : index
    %c0_22 = arith.constant 0 : index
    %24 = vector.load %arg9[%c0_21, %c0_22] : memref<64x1xf32, #tpu.memory_space<vmem>>, vector<64x1xf32>
    %25 = vector.broadcast %24 : vector<64x1xf32> to vector<64x128xf32>
    %26 = arith.addf %23, %25 : vector<64x128xf32>
    %cst_23 = arith.constant 0.000000e+00 : f32
    %27 = vector.broadcast %cst_23 : f32 to vector<64x128xf32>
    %28 = arith.maximumf %26, %27 : vector<64x128xf32>
    %c0_24 = arith.constant 0 : index
    %c0_25 = arith.constant 0 : index
    %29 = vector.load %arg10[%c0_24, %c0_25] : memref<16x64xf32, #tpu.memory_space<vmem>>, vector<16x64xf32>
    %cst_26 = arith.constant dense<0.000000e+00> : vector<16x128xf32>
    %30 = tpu.matmul %29, %28, %cst_26 {dimension_numbers = #tpu.dot_dimension_numbers<[1], [0], [0], [1], [0, 0, 1, 1], [], []>} : vector<16x64xf32>, vector<64x128xf32>, vector<16x128xf32> -> vector<16x128xf32>
    %c0_27 = arith.constant 0 : index
    %c0_28 = arith.constant 0 : index
    %31 = vector.load %arg11[%c0_27, %c0_28] : memref<16x1xf32, #tpu.memory_space<vmem>>, vector<16x1xf32>
    %32 = vector.broadcast %31 : vector<16x1xf32> to vector<16x128xf32>
    %33 = arith.addf %30, %32 : vector<16x128xf32>
    %cst_29 = arith.constant 0.000000e+00 : f32
    %34 = vector.broadcast %cst_29 : f32 to vector<16x128xf32>
    %35 = arith.maximumf %33, %34 : vector<16x128xf32>
    %c0_30 = arith.constant 0 : index
    %c0_31 = arith.constant 0 : index
    %36 = vector.load %arg12[%c0_30, %c0_31] : memref<16x1xf32, #tpu.memory_space<vmem>>, vector<16x1xf32>
    %37 = vector.broadcast %36 : vector<16x1xf32> to vector<16x128xf32>
    %38 = arith.mulf %35, %37 : vector<16x128xf32>
    %cst_32 = arith.constant dense<0.000000e+00> : vector<128xf32>
    %39 = vector.multi_reduction <add>, %38, %cst_32 [0] : vector<16x128xf32> to vector<128xf32>
    %40 = vector.shape_cast %39 : vector<128xf32> to vector<1x128xf32>
    %c0_33 = arith.constant 0 : index
    %c0_34 = arith.constant 0 : index
    %41 = vector.load %arg13[%c0_33, %c0_34] : memref<1x1xf32, #tpu.memory_space<vmem>>, vector<1x1xf32>
    %42 = vector.broadcast %41 : vector<1x1xf32> to vector<1x128xf32>
    %43 = arith.addf %40, %42 : vector<1x128xf32>
    %c0_35 = arith.constant 0 : index
    %c0_36 = arith.constant 0 : index
    %44 = vector.load %arg14[%c0_35, %c0_36] : memref<1x128xf32, #tpu.memory_space<vmem>>, vector<1x128xf32>
    tpu.vector_store %arg14[%c0_35, %c0_36], %43 {strides = array<i32>} : memref<1x128xf32, #tpu.memory_space<vmem>>, vector<1x128xf32>,
    return
  }
  func.func @transform_0(%arg0: i32) -> (i32, i32) {
    %c0_i32 = arith.constant 0 : i32
    %c0_i32_0 = arith.constant 0 : i32
    return %c0_i32, %arg0 : i32, i32
  }
  func.func @transform_1(%arg0: i32) -> (i32, i32) {
    %c0_i32 = arith.constant 0 : i32
    %c0_i32_0 = arith.constant 0 : i32
    %c0_i32_1 = arith.constant 0 : i32
    return %c0_i32, %c0_i32_0 : i32, i32
  }
  func.func @transform_2(%arg0: i32) -> (i32, i32) {
    %c0_i32 = arith.constant 0 : i32
    %c0_i32_0 = arith.constant 0 : i32
    %c0_i32_1 = arith.constant 0 : i32
    return %c0_i32, %c0_i32_0 : i32, i32
  }
  func.func @transform_3(%arg0: i32) -> (i32, i32) {
    %c0_i32 = arith.constant 0 : i32
    %c0_i32_0 = arith.constant 0 : i32
    %c0_i32_1 = arith.constant 0 : i32
    return %c0_i32, %c0_i32_0 : i32, i32
  }
  func.func @transform_4(%arg0: i32) -> (i32, i32) {
    %c0_i32 = arith.constant 0 : i32
    %c0_i32_0 = arith.constant 0 : i32
    %c0_i32_1 = arith.constant 0 : i32
    return %c0_i32, %c0_i32_0 : i32, i32
  }
  func.func @transform_5(%arg0: i32) -> (i32, i32) {
    %c0_i32 = arith.constant 0 : i32
    %c0_i32_0 = arith.constant 0 : i32
    %c0_i32_1 = arith.constant 0 : i32
    return %c0_i32, %c0_i32_0 : i32, i32
  }
  func.func @transform_6(%arg0: i32) -> (i32, i32) {
    %c0_i32 = arith.constant 0 : i32
    %c0_i32_0 = arith.constant 0 : i32
    %c0_i32_1 = arith.constant 0 : i32
    return %c0_i32, %c0_i32_0 : i32, i32
  }
  func.func @transform_7(%arg0: i32) -> (i32, i32) {
    %c0_i32 = arith.constant 0 : i32
    %c0_i32_0 = arith.constant 0 : i32
    %c0_i32_1 = arith.constant 0 : i32
    return %c0_i32, %c0_i32_0 : i32, i32
  }
  func.func @transform_8(%arg0: i32) -> (i32, i32) {
    %c0_i32 = arith.constant 0 : i32
    %c0_i32_0 = arith.constant 0 : i32
    %c0_i32_1 = arith.constant 0 : i32
    return %c0_i32, %c0_i32_0 : i32, i32
  }
  func.func @transform_9(%arg0: i32) -> (i32, i32) {
    %c0_i32 = arith.constant 0 : i32
    %c0_i32_0 = arith.constant 0 : i32
    %c0_i32_1 = arith.constant 0 : i32
    return %c0_i32, %c0_i32_0 : i32, i32
  }
  func.func @transform_10(%arg0: i32) -> (i32, i32) {
    %c0_i32 = arith.constant 0 : i32
    %c0_i32_0 = arith.constant 0 : i32
    %c0_i32_1 = arith.constant 0 : i32
    return %c0_i32, %c0_i32_0 : i32, i32
  }
  func.func @transform_11(%arg0: i32) -> (i32, i32) {
    %c0_i32 = arith.constant 0 : i32
    %c0_i32_0 = arith.constant 0 : i32
    %c0_i32_1 = arith.constant 0 : i32
    return %c0_i32, %c0_i32_0 : i32, i32
  }
  func.func @transform_12(%arg0: i32) -> (i32, i32) {
    %c0_i32 = arith.constant 0 : i32
    %c0_i32_0 = arith.constant 0 : i32
    %c0_i32_1 = arith.constant 0 : i32
    return %c0_i32, %c0_i32_0 : i32, i32
  }
  func.func @transform_13(%arg0: i32) -> (i32, i32) {
    %c0_i32 = arith.constant 0 : i32
    %c0_i32_0 = arith.constant 0 : i32
    return %c0_i32, %arg0 : i32, i32
  }
}

</mosaic_0001>

<bundles_post_ra>
// kernel: cbf_forward.1
= control target key start
LH: loop header
LB: loop body
LE: loop exit
PB: predicated region body
PF: predicated region fallthrough
CT: control target
= control target key end

     0   :  { %vm61_vm0 = vcmask 64512   ;;  %v1258_v3 = vmov 0   ;;  %vm201_vm1 = vcmask 130048   ;;  %vm451_vm2 = vcmask 523264   ;;  %s1588_s0 = inlined_call_operand.vmem [shape: f32[8,128], index: 0, kind: input, shape index: {}]   ;;  %s1589_s1 = inlined_call_operand.vmem [shape: f32[16,8], index: 1, kind: input, shape index: {}]   ;;  %s1590_s2 = inlined_call_operand.vmem [shape: f32[16,1], index: 2, kind: input, shape index: {}]   ;;  %s1591_s12 = inlined_call_operand.<no memory space> [shape: f32[1,1], index: 12, kind: input, shape index: {}]   ;;  %s1592_s4 = inlined_call_operand.vmem [shape: f32[64,1], index: 4, kind: input, shape index: {}]   ;;  %s1593_s6 = inlined_call_operand.vmem [shape: f32[128,1], index: 6, kind: input, shape index: {}]   ;;  %s1594_s8 = inlined_call_operand.vmem [shape: f32[64,1], index: 8, kind: input, shape index: {}]   ;;  %s1595_s10 = inlined_call_operand.vmem [shape: f32[16,1], index: 10, kind: input, shape index: {}]   ;;  %s1596_s11 = inlined_call_operand.vmem [shape: f32[16,1], index: 11, kind: input, shape index: {}]   ;;  %s1597_s3 = inlined_call_operand.vmem [shape: f32[64,16], index: 3, kind: input, shape index: {}]   ;;  %s1598_s5 = inlined_call_operand.vmem [shape: f32[128,64], index: 5, kind: input, shape index: {}]   ;;  %s1599_s7 = inlined_call_operand.vmem [shape: f32[64,128], index: 7, kind: input, shape index: {}]   ;;  %s1600_s9 = inlined_call_operand.vmem [shape: f32[16,64], index: 9, kind: input, shape index: {}]   ;;  %s1601_s13 = inlined_call_operand.vmem [shape: f32[1,128], index: 13, kind: output, shape index: {}]  }
   0x1   :  { %v46_v0 = vld [vmem:[%s1588_s0] sm:$0xff]  ;;  %v48_v2 = vld [vmem:[%s1589_s1 + $0x8] sm:$0xff]  ;;  %1256 = vset.pattern.permute.xlu0 %v1258_v3  ;;  %v18_v4 = vstv %s1591_s12  ;;  %1257 = vset.pattern.permute.xlu1 %v1258_v3  ;;  %v155_v7 = vld [vmem:[%s1592_s4 + $0x10] sm:$0xff] }
   0x2   :  { %v47_v1 = vld [vmem:[%s1589_s1] sm:$0xff]  ;;  %1063 = vmatprep.subr.mxu0 %v46_v0  ;;  %19 = vst [vmem:[#allocation2] sm:$0x1] %v18_v4  ;;  %v50_v6 = vld [vmem:[%s1590_s2 + $0x8] sm:$0xff]  ;;  %v159_v9 = vld [vmem:[%s1592_s4 + $0x30] sm:$0xff] }
   0x3   :  { %1065 = vmatprep.mubr.msk.f32.mxu0 %vm61_vm0, %v47_v1  ;;  %v49_v5 = vld [vmem:[%s1590_s2] sm:$0xff]  ;;  %1064 = vmatpush3.msra.mxu0 %v46_v0  ;;  %v357_v11 = vld [vmem:[%s1593_s6 + $0x10] sm:$0xff]  ;;  %v154_v27 = vld [vmem:[%s1592_s4 + $0x8] sm:$0xff] }
   0x4   :  { %53 = vperm.xlu0 %1256, %v49_v5   ;;  %1066 = vmatmul.mubr.msk.f32.vlgmr.msra.gmra.mrb[0].mxu0 %vm61_vm0, %v48_v2  ;;  %v157_v8 = vld [vmem:[%s1592_s4 + $0x20] sm:$0xff]  ;;  %v361_v13 = vld [vmem:[%s1593_s6 + $0x30] sm:$0xff]  ;;  %v156_v28 = vld [vmem:[%s1592_s4 + $0x18] sm:$0xff] }
   0x5   :  { %v355_v10 = vld [vmem:[%s1593_s6] sm:$0xff]  ;;  %v365_v15 = vld [vmem:[%s1593_s6 + $0x50] sm:$0xff]  ;;  %v158_v29 = vld [vmem:[%s1592_s4 + $0x28] sm:$0xff] }
   0x6   :  { %v359_v12 = vld [vmem:[%s1593_s6 + $0x20] sm:$0xff]  ;;  %v369_v17 = vld [vmem:[%s1593_s6 + $0x70] sm:$0xff]  ;;  %v160_v30 = vld [vmem:[%s1592_s4 + $0x38] sm:$0xff] }
   0x7   :  { %v363_v14 = vld [vmem:[%s1593_s6 + $0x40] sm:$0xff]  ;;  %v671_v19 = vld [vmem:[%s1594_s8 + $0x10] sm:$0xff]  ;;  %v356_v31 = vld [vmem:[%s1593_s6 + $0x8] sm:$0xff] }
   0x8   :  { %58 = vperm.xlu0 %1256, %v50_v6   ;;  %v367_v16 = vld [vmem:[%s1593_s6 + $0x60] sm:$0xff]  ;;  %v675_v21 = vld [vmem:[%s1594_s8 + $0x30] sm:$0xff]  ;;  %v358_v32 = vld [vmem:[%s1593_s6 + $0x18] sm:$0xff] }
   0x9   :  { %v669_v18 = vld [vmem:[%s1594_s8] sm:$0xff]  ;;  %v360_v33 = vld [vmem:[%s1593_s6 + $0x28] sm:$0xff]  ;;  %v362_v34 = vld [vmem:[%s1593_s6 + $0x38] sm:$0xff] }
   0xa   :  { %v673_v20 = vld [vmem:[%s1594_s8 + $0x20] sm:$0xff]  ;;  %v364_v35 = vld [vmem:[%s1593_s6 + $0x48] sm:$0xff]  ;;  %v366_v36 = vld [vmem:[%s1593_s6 + $0x58] sm:$0xff] }
   0xb   :  { %v832_v22 = vld [vmem:[%s1595_s10] sm:$0xff]  ;;  %v368_v37 = vld [vmem:[%s1593_s6 + $0x68] sm:$0xff]  ;;  %v370_v38 = vld [vmem:[%s1593_s6 + $0x78] sm:$0xff] }
   0xc   :  { %173 = vperm.xlu0 %1256, %v155_v7   ;;  %v927_v23 = vld [vmem:[%s1596_s11] sm:$0xff]  ;;  %v670_v39 = vld [vmem:[%s1594_s8 + $0x8] sm:$0xff]  ;;  %v672_v40 = vld [vmem:[%s1594_s8 + $0x18] sm:$0xff] }
   0xd   :  { %v948_v24 = vld [vmem:[#allocation2] sm:$0x1]  ;;  %v674_v41 = vld [vmem:[%s1594_s8 + $0x28] sm:$0xff]  ;;  %v676_v42 = vld [vmem:[%s1594_s8 + $0x38] sm:$0xff] }
   0xe   :  { %v145_v25 = vld [vmem:[%s1597_s3] sm:$0xff]  ;;  %v833_v43 = vld [vmem:[%s1595_s10 + $0x8] sm:$0xff]  ;;  %v147_v55 = vld [vmem:[%s1597_s3 + $0x10] sm:$0xff] }
   0xf   :  { %1072 = vmatprep.mubr.msk.f32.mxu1 %vm201_vm1, %v145_v25  ;;  %v153_v26 = vld [vmem:[%s1592_s4] sm:$0xff]  ;;  %v928_v44 = vld [vmem:[%s1596_s11 + $0x8] sm:$0xff]  ;;  %v148_v56 = vld [vmem:[%s1597_s3 + $0x18] sm:$0xff] }
  0x10   :  { %183 = vperm.xlu0 %1256, %v157_v8   ;;  %163 = vperm.xlu1 %1257, %v153_v26   ;;  %v146_v54 = vld [vmem:[%s1597_s3 + $0x8] sm:$0xff]  ;;  %v149_v57 = vld [vmem:[%s1597_s3 + $0x20] sm:$0xff]  ;;  %v151_v59 = vld [vmem:[%s1597_s3 + $0x30] sm:$0xff] }
  0x11   :  { %v150_v58 = vld [vmem:[%s1597_s3 + $0x28] sm:$0xff]  ;;  %v152_v60 = vld [vmem:[%s1597_s3 + $0x38] sm:$0xff]  ;;  %v339_v61 = vld [vmem:[%s1598_s5] sm:$0xff] }
  0x12   :  { %1100 = vmatprep.mubr.msk.f32.mxu0 %vm451_vm2, %v339_v61 }
  0x14   :  { %193 = vperm.xlu0 %1256, %v159_v9   ;;  %168 = vperm.xlu1 %1257, %v154_v27  }
  0x18   :  { %373 = vperm.xlu0 %1256, %v355_v10   ;;  %178 = vperm.xlu1 %1257, %v156_v28  }
  0x1c   :  { %383 = vperm.xlu0 %1256, %v357_v11   ;;  %188 = vperm.xlu1 %1257, %v158_v29  }
  0x20   :  { %393 = vperm.xlu0 %1256, %v359_v12   ;;  %198 = vperm.xlu1 %1257, %v160_v30  }
  0x24   :  { %403 = vperm.xlu0 %1256, %v361_v13   ;;  %378 = vperm.xlu1 %1257, %v356_v31  }
  0x28   :  { %413 = vperm.xlu0 %1256, %v363_v14   ;;  %388 = vperm.xlu1 %1257, %v358_v32  }
  0x2c   :  { %423 = vperm.xlu0 %1256, %v365_v15   ;;  %398 = vperm.xlu1 %1257, %v360_v33  }
  0x30   :  { %433 = vperm.xlu0 %1256, %v367_v16   ;;  %408 = vperm.xlu1 %1257, %v362_v34   ;;  %v340_v34 = vld [vmem:[%s1598_s5 + $0x8] sm:$0xff] }
  0x34   :  { %443 = vperm.xlu0 %1256, %v369_v17   ;;  %418 = vperm.xlu1 %1257, %v364_v35   ;;  %v341_v35 = vld [vmem:[%s1598_s5 + $0x10] sm:$0xff] }
  0x38   :  { %679 = vperm.xlu0 %1256, %v669_v18   ;;  %428 = vperm.xlu1 %1257, %v366_v36   ;;  %v342_v36 = vld [vmem:[%s1598_s5 + $0x18] sm:$0xff] }
  0x3c   :  { %689 = vperm.xlu0 %1256, %v671_v19   ;;  %438 = vperm.xlu1 %1257, %v368_v37   ;;  %v343_v37 = vld [vmem:[%s1598_s5 + $0x20] sm:$0xff] }
  0x40   :  { %699 = vperm.xlu0 %1256, %v673_v20   ;;  %448 = vperm.xlu1 %1257, %v370_v38   ;;  %v344_v38 = vld [vmem:[%s1598_s5 + $0x28] sm:$0xff] }
  0x44   :  { %709 = vperm.xlu0 %1256, %v675_v21   ;;  %684 = vperm.xlu1 %1257, %v670_v39   ;;  %v345_v39 = vld [vmem:[%s1598_s5 + $0x30] sm:$0xff] }
  0x48   :  { %836 = vperm.xlu0 %1256, %v832_v22   ;;  %694 = vperm.xlu1 %1257, %v672_v40   ;;  %v346_v40 = vld [vmem:[%s1598_s5 + $0x38] sm:$0xff] }
  0x4c   :  { %931 = vperm.xlu0 %1256, %v927_v23   ;;  %704 = vperm.xlu1 %1257, %v674_v41   ;;  %v347_v41 = vld [vmem:[%s1598_s5 + $0x40] sm:$0xff] }
  0x50   :  { %951 = vperm.xlu0 %1256, %v948_v24   ;;  %714 = vperm.xlu1 %1257, %v676_v42   ;;  %v348_v42 = vld [vmem:[%s1598_s5 + $0x48] sm:$0xff] }
  0x54   :  { %841 = vperm.xlu1 %1257, %v833_v43   ;;  %v349_v43 = vld [vmem:[%s1598_s5 + $0x50] sm:$0xff] }
  0x58   :  { %936 = vperm.xlu1 %1257, %v928_v44   ;;  %v350_v44 = vld [vmem:[%s1598_s5 + $0x58] sm:$0xff] }
  0x83   :  { %v54_v45 = vpop.permute.xlu0 %53 }
  0x87   :  { %v59_v46 = vpop.permute.xlu0 %58 }
  0x8b   :  { %v174_v2 = vpop.permute.xlu0 %173 }
  0x8f   :  { %v164_v62 = vpop.permute.xlu1 %163  ;;  %v184_v14 = vpop.permute.xlu0 %183 }
  0x93   :  { %v169_v63 = vpop.permute.xlu1 %168  ;;  %v194_v26 = vpop.permute.xlu0 %193 }
  0x97   :  { %v179_v0 = vpop.permute.xlu1 %178 }
  0x9b   :  { %v189_v11 = vpop.permute.xlu1 %188 }
  0x9f   :  { %v199_v23 = vpop.permute.xlu1 %198 }
  0xd7   :  { %v1067_v47 = vpop.f32.mrb[0].mxu0 }
  0xd8   :  { %v140_v48 = vadd.f32 %v1067_v47, %v59_v46  ;;  %v134_v49 = vpop.f32.mrb[1].mxu0  ;;  %v352_v46 = vld [vmem:[%s1598_s5 + $0x68] sm:$0xff]  ;;  %v353_v47 = vld [vmem:[%s1598_s5 + $0x70] sm:$0xff] }
  0xd9   :  { %v135_v50 = vadd.f32 %v134_v49, %v54_v45  ;;  %v351_v45 = vld [vmem:[%s1598_s5 + $0x60] sm:$0xff] }
  0xda   :  { %v144_v51 = vmax.f32 %v140_v48, 0.0  ;;  %v354_v48 = vld [vmem:[%s1598_s5 + $0x78] sm:$0xff]  ;;  %v661_v49 = vld [vmem:[%s1599_s7] sm:$0xff] }
  0xdb   :  { %v143_v52 = vmax.f32 %v135_v50, 0.0  ;;  %v379_v50 = vpop.permute.xlu1 %378 }
  0xdd   :  { %v1187_v53 = vpack.c.bf16 %v144_v51, %v143_v52  ;;  %v374_v51 = vpop.permute.xlu0 %373 }
  0xdf   :  { %1188 = vmatprep.subr.bf16.mxu1 %v1187_v53  ;;  %v389_v52 = vpop.permute.xlu1 %388 }
  0xe0   :  { %1190 = vmatpush3.bf16.msra.mxu1 %v1187_v53 }
  0xe1   :  { %v384_v53 = vpop.permute.xlu0 %383 }
  0xe3   :  { %1073 = vmatmul.mubr.msk.f32.vlgmr.msra.gmra.mrb[0].mxu1 %vm201_vm1, %v146_v54  ;;  %v399_v54 = vpop.permute.xlu1 %398 }
  0xe4   :  { %1075 = vmatprep.mubr.msk.f32.mxu1 %vm201_vm1, %v147_v55 }
  0xe5   :  { %v394_v55 = vpop.permute.xlu0 %393 }
  0xe7   :  { %1076 = vmatmul.mubr.msk.f32.gmra.mrb[2].mxu1 %vm201_vm1, %v148_v56  ;;  %v409_v61 = vpop.permute.xlu1 %408 }
  0xe8   :  { %1078 = vmatprep.mubr.msk.f32.mxu1 %vm201_vm1, %v149_v57 }
  0xeb   :  { %1079 = vmatmul.mubr.msk.f32.gmra.mrb[4].mxu1 %vm201_vm1, %v150_v58 }
  0xec   :  { %1081 = vmatprep.mubr.msk.f32.mxu1 %vm201_vm1, %v151_v59 }
  0xef   :  { %1082 = vmatmul.mubr.msk.f32.gmra.mrb[6].mxu1 %vm201_vm1, %v152_v60 }
  0xf0   :  { %1156 = vmatprep.mubr.f32.mxu1 %v661_v49 }
 0x1b6   :  { %v1074_v1 = vpop.f32.mrb[0].mxu1 }
 0x1b7   :  { %v298_v3 = vadd.f32 %v1074_v1, %v169_v63  ;;  %v292_v4 = vpop.f32.mrb[1].mxu1 }
 0x1b8   :  { %v293_v5 = vadd.f32 %v292_v4, %v164_v62 }
 0x1b9   :  { %v332_v6 = vmax.f32 %v298_v3, 0.0 }
 0x1ba   :  { %v331_v7 = vmax.f32 %v293_v5, 0.0  ;;  %v1077_v8 = vpop.f32.mrb[2].mxu1 }
 0x1bb   :  { %v308_v9 = vadd.f32 %v1077_v8, %v179_v0  ;;  %v302_v10 = vpop.f32.mrb[3].mxu1  ;;  %v404_v0 = vpop.permute.xlu0 %403 }
 0x1bc   :  { %v1191_v12 = vpack.c.bf16 %v332_v6, %v331_v7  ;;  %v303_v13 = vadd.f32 %v302_v10, %v174_v2  ;;  %v419_v10 = vpop.permute.xlu1 %418 }
 0x1bd   :  { %v334_v15 = vmax.f32 %v308_v9, 0.0 }
 0x1be   :  { %v333_v16 = vmax.f32 %v303_v13, 0.0  ;;  %v1080_v17 = vpop.f32.mrb[4].mxu1  ;;  %1192 = vmatprep.subr.bf16.mxu0 %v1191_v12 }
 0x1bf   :  { %v318_v18 = vadd.f32 %v1080_v17, %v189_v11  ;;  %v312_v19 = vpop.f32.mrb[5].mxu1  ;;  %1194 = vmatpush3.bf16.msra.mxu0 %v1191_v12  ;;  %v414_v13 = vpop.permute.xlu0 %413 }
 0x1c0   :  { %v1195_v20 = vpack.c.bf16 %v334_v15, %v333_v16  ;;  %v313_v21 = vadd.f32 %v312_v19, %v184_v14 }
 0x1c1   :  { %v336_v22 = vmax.f32 %v318_v18, 0.0 }
 0x1c2   :  { %v335_v24 = vmax.f32 %v313_v21, 0.0  ;;  %v1083_v25 = vpop.f32.mrb[6].mxu1  ;;  %1196 = vmatprep.subr.bf16.mxu0 %v1195_v20 }
 0x1c3   :  { %v328_v27 = vadd.f32 %v1083_v25, %v199_v23  ;;  %v322_v28 = vpop.f32.mrb[7].mxu1  ;;  %1198 = vmatpush3.bf16.msra.mxu0 %v1195_v20  ;;  %v424_v25 = vpop.permute.xlu0 %423 }
 0x1c4   :  { %v1199_v29 = vpack.c.bf16 %v336_v22, %v335_v24  ;;  %v323_v30 = vadd.f32 %v322_v28, %v194_v26  ;;  %v429_v22 = vpop.permute.xlu1 %428 }
 0x1c5   :  { %v338_v31 = vmax.f32 %v328_v27, 0.0 }
 0x1c6   :  { %v337_v32 = vmax.f32 %v323_v30, 0.0  ;;  %1200 = vmatprep.subr.bf16.mxu0 %v1199_v29 }
 0x1c7   :  { %1202 = vmatpush3.bf16.msra.mxu0 %v1199_v29 }
 0x1c8   :  { %v1203_v33 = vpack.c.bf16 %v338_v31, %v337_v32 }
 0x1ca   :  { %1204 = vmatprep.subr.bf16.mxu0 %v1203_v33 }
 0x1cb   :  { %1206 = vmatpush3.bf16.msra.mxu0 %v1203_v33 }
 0x1ce   :  { %1101 = vmatmul.mubr.msk.f32.vlgmr.msra.gmra.mrb[2].mxu0 %vm451_vm2, %v340_v34 }
 0x1cf   :  { %1103 = vmatprep.mubr.msk.f32.mxu0 %vm451_vm2, %v341_v35  ;;  %v439_v35 = vpop.permute.xlu1 %438 }
 0x1d2   :  { %1104 = vmatmul.mubr.msk.f32.gmra.mrb[4].mxu0 %vm451_vm2, %v342_v36 }
 0x1d3   :  { %1106 = vmatprep.mubr.msk.f32.mxu0 %vm451_vm2, %v343_v37 }
 0x1d6   :  { %1107 = vmatmul.mubr.msk.f32.gmra.mrb[6].mxu0 %vm451_vm2, %v344_v38  ;;  %v434_v38 = vpop.permute.xlu0 %433 }
 0x1d7   :  { %1109 = vmatprep.mubr.msk.f32.mxu0 %vm451_vm2, %v345_v39 }
 0x1da   :  { %1110 = vmatmul.mubr.msk.f32.gmra.mrb[8].mxu0 %vm451_vm2, %v346_v40 }
 0x1db   :  { %1112 = vmatprep.mubr.msk.f32.mxu0 %vm451_vm2, %v347_v41 }
 0x1de   :  { %1113 = vmatmul.mubr.msk.f32.gmra.mrb[10].mxu0 %vm451_vm2, %v348_v42 }
 0x1df   :  { %1115 = vmatprep.mubr.msk.f32.mxu0 %vm451_vm2, %v349_v43 }
 0x1e2   :  { %1116 = vmatmul.mubr.msk.f32.gmra.mrb[12].mxu0 %vm451_vm2, %v350_v44 }
 0x1e3   :  { %1118 = vmatprep.mubr.msk.f32.mxu0 %vm451_vm2, %v351_v45 }
 0x1e6   :  { %1119 = vmatmul.mubr.msk.f32.gmra.mrb[14].mxu0 %vm451_vm2, %v352_v46 }
 0x1e7   :  { %1121 = vmatprep.mubr.msk.f32.mxu0 %vm451_vm2, %v353_v47  ;;  %v449_v47 = vpop.permute.xlu1 %448 }
 0x1ea   :  { %1122 = vmatmul.mubr.msk.f32.gmra.mrb[16].mxu0 %vm451_vm2, %v354_v48 }
 0x2a1   :  { %v1102_v56 = vpop.f32.mrb[2].mxu0 }
 0x2a2   :  { %v572_v57 = vadd.f32 %v1102_v56, %v379_v50  ;;  %v566_v58 = vpop.f32.mrb[3].mxu0  ;;  %v444_v50 = vpop.permute.xlu0 %443 }
 0x2a3   :  { %v567_v59 = vadd.f32 %v566_v58, %v374_v51  ;;  %v662_v58 = vld [vmem:[%s1599_s7 + $0x8] sm:$0xff] }
 0x2a4   :  { %v646_v60 = vmax.f32 %v572_v57, 0.0 }
 0x2a5   :  { %v645_v62 = vmax.f32 %v567_v59, 0.0  ;;  %v1105_v63 = vpop.f32.mrb[4].mxu0  ;;  %v663_v59 = vld [vmem:[%s1599_s7 + $0x10] sm:$0xff] }
 0x2a6   :  { %v582_v1 = vadd.f32 %v1105_v63, %v389_v52  ;;  %v576_v2 = vpop.f32.mrb[5].mxu0  ;;  %v667_v63 = vld [vmem:[%s1599_s7 + $0x30] sm:$0xff] }
 0x2a7   :  { %v1207_v3 = vpack.c.bf16 %v646_v60, %v645_v62  ;;  %v577_v4 = vadd.f32 %v576_v2, %v384_v53  ;;  %v664_v60 = vld [vmem:[%s1599_s7 + $0x18] sm:$0xff]  ;;  %v666_v62 = vld [vmem:[%s1599_s7 + $0x28] sm:$0xff]  ;;  %v685_v2 = vpop.permute.xlu1 %684 }
 0x2a8   :  { %v648_v5 = vmax.f32 %v582_v1, 0.0  ;;  %v830_v1 = vld [vmem:[%s1600_s9] sm:$0xff] }
 0x2a9   :  { %v647_v6 = vmax.f32 %v577_v4, 0.0  ;;  %v1108_v7 = vpop.f32.mrb[6].mxu0  ;;  %1208 = vmatprep.subr.bf16.mxu1 %v1207_v3  ;;  %1184 = vmatprep.mubr.msk.f32.mxu0 %vm451_vm2, %v830_v1 }
 0x2aa   :  { %v592_v8 = vadd.f32 %v1108_v7, %v399_v54  ;;  %v586_v9 = vpop.f32.mrb[7].mxu0  ;;  %1210 = vmatpush3.bf16.msra.mxu1 %v1207_v3  ;;  %v680_v3 = vpop.permute.xlu0 %679 }
 0x2ab   :  { %v1211_v11 = vpack.c.bf16 %v648_v5, %v647_v6  ;;  %v587_v12 = vadd.f32 %v586_v9, %v394_v55  ;;  %v695_v4 = vpop.permute.xlu1 %694 }
 0x2ac   :  { %v650_v14 = vmax.f32 %v592_v8, 0.0 }
 0x2ad   :  { %v649_v15 = vmax.f32 %v587_v12, 0.0  ;;  %v1111_v16 = vpop.f32.mrb[8].mxu0  ;;  %1212 = vmatprep.subr.bf16.mxu1 %v1211_v11 }
 0x2ae   :  { %v602_v17 = vadd.f32 %v1111_v16, %v409_v61  ;;  %v596_v18 = vpop.f32.mrb[9].mxu0  ;;  %1214 = vmatpush3.bf16.msra.mxu1 %v1211_v11  ;;  %v665_v61 = vld [vmem:[%s1599_s7 + $0x20] sm:$0xff]  ;;  %v690_v6 = vpop.permute.xlu0 %689 }
 0x2af   :  { %v1215_v19 = vpack.c.bf16 %v650_v14, %v649_v15  ;;  %v597_v20 = vadd.f32 %v596_v18, %v404_v0  ;;  %v668_v0 = vld [vmem:[%s1599_s7 + $0x38] sm:$0xff]  ;;  %v705_v15 = vpop.permute.xlu1 %704 }
 0x2b0   :  { %v652_v21 = vmax.f32 %v602_v17, 0.0 }
 0x2b1   :  { %v651_v23 = vmax.f32 %v597_v20, 0.0  ;;  %v1114_v24 = vpop.f32.mrb[10].mxu0  ;;  %1216 = vmatprep.subr.bf16.mxu1 %v1215_v19 }
 0x2b2   :  { %v612_v26 = vadd.f32 %v1114_v24, %v419_v10  ;;  %v606_v27 = vpop.f32.mrb[11].mxu0  ;;  %1218 = vmatpush3.bf16.msra.mxu1 %v1215_v19  ;;  %v700_v18 = vpop.permute.xlu0 %699 }
 0x2b3   :  { %v1219_v28 = vpack.c.bf16 %v652_v21, %v651_v23  ;;  %v607_v29 = vadd.f32 %v606_v27, %v414_v13  ;;  %v715_v27 = vpop.permute.xlu1 %714 }
 0x2b4   :  { %v654_v30 = vmax.f32 %v612_v26, 0.0 }
 0x2b5   :  { %v653_v31 = vmax.f32 %v607_v29, 0.0  ;;  %v1117_v32 = vpop.f32.mrb[12].mxu0  ;;  %1220 = vmatprep.subr.bf16.mxu1 %v1219_v28 }
 0x2b6   :  { %v622_v33 = vadd.f32 %v1117_v32, %v429_v22  ;;  %v616_v34 = vpop.f32.mrb[13].mxu0  ;;  %1222 = vmatpush3.bf16.msra.mxu1 %v1219_v28 }
 0x2b7   :  { %v1223_v36 = vpack.c.bf16 %v654_v30, %v653_v31  ;;  %v617_v37 = vadd.f32 %v616_v34, %v424_v25  ;;  %v710_v30 = vpop.permute.xlu0 %709 }
 0x2b8   :  { %v656_v39 = vmax.f32 %v622_v33, 0.0 }
 0x2b9   :  { %v655_v40 = vmax.f32 %v617_v37, 0.0  ;;  %v1120_v41 = vpop.f32.mrb[14].mxu0  ;;  %1224 = vmatprep.subr.bf16.mxu1 %v1223_v36 }
 0x2ba   :  { %v632_v42 = vadd.f32 %v1120_v41, %v439_v35  ;;  %v626_v43 = vpop.f32.mrb[15].mxu0  ;;  %1226 = vmatpush3.bf16.msra.mxu1 %v1223_v36 }
 0x2bb   :  { %v1227_v44 = vpack.c.bf16 %v656_v39, %v655_v40  ;;  %v627_v45 = vadd.f32 %v626_v43, %v434_v38  ;;  %v831_v38 = vld [vmem:[%s1600_s9 + $0x8] sm:$0xff]  ;;  %v842_v39 = vpop.permute.xlu1 %841  ;;  %v837_v40 = vpop.permute.xlu0 %836 }
 0x2bc   :  { %v658_v46 = vmax.f32 %v632_v42, 0.0 }
 0x2bd   :  { %v657_v48 = vmax.f32 %v627_v45, 0.0  ;;  %v1123_v49 = vpop.f32.mrb[16].mxu0  ;;  %1228 = vmatprep.subr.bf16.mxu1 %v1227_v44 }
 0x2be   :  { %v642_v51 = vadd.f32 %v1123_v49, %v449_v47  ;;  %v636_v52 = vpop.f32.mrb[17].mxu0  ;;  %1230 = vmatpush3.bf16.msra.mxu1 %v1227_v44 }
 0x2bf   :  { %v1231_v53 = vpack.c.bf16 %v658_v46, %v657_v48  ;;  %v637_v54 = vadd.f32 %v636_v52, %v444_v50  ;;  %v937_v46 = vpop.permute.xlu1 %936  ;;  %v932_v48 = vpop.permute.xlu0 %931 }
 0x2c0   :  { %v660_v55 = vmax.f32 %v642_v51, 0.0  ;;  %v954_v51 = vlaneseq }
 0x2c1   :  { %v659_v56 = vmax.f32 %v637_v54, 0.0  ;;  %1232 = vmatprep.subr.bf16.mxu1 %v1231_v53 }
 0x2c2   :  { %1234 = vmatpush3.bf16.msra.mxu1 %v1231_v53  ;;  %v955_v54 = vshrl.u32 %v954_v51, 7 }
 0x2c3   :  { %v1235_v57 = vpack.c.bf16 %v660_v55, %v659_v56 }
 0x2c5   :  { %1236 = vmatprep.subr.bf16.mxu1 %v1235_v57 }
 0x2c6   :  { %1238 = vmatpush3.bf16.msra.mxu1 %v1235_v57  ;;  %v956_v57 = vsub.s32 0, %v955_v54 }
 0x2c9   :  { %1157 = vmatmul.mubr.f32.vlgmr.msra.gmra.mrb[8].mxu1 %v662_v58 }
 0x2ca   :  { %1159 = vmatprep.mubr.f32.mxu1 %v663_v59  ;;  %v952_v59 = vpop.permute.xlu0 %951 }
 0x2cd   :  { %1160 = vmatmul.mubr.f32.gmra.mrb[10].mxu1 %v664_v60 }
 0x2ce   :  { %1162 = vmatprep.mubr.f32.mxu1 %v665_v61  ;;  %v957_v61 = vrot.slane %v952_v59, %v956_v57 }
 0x2d1   :  { %1163 = vmatmul.mubr.f32.gmra.mrb[12].mxu1 %v666_v62 }
 0x2d2   :  { %1165 = vmatprep.mubr.f32.mxu1 %v667_v63 }
 0x2d5   :  { %1166 = vmatmul.mubr.f32.gmra.mrb[14].mxu1 %v668_v0 }
 0x39c   :  { %v1158_v5 = vpop.f32.mrb[8].mxu1 }
 0x39d   :  { %v789_v7 = vadd.f32 %v1158_v5, %v685_v2  ;;  %v783_v8 = vpop.f32.mrb[9].mxu1 }
 0x39e   :  { %v784_v9 = vadd.f32 %v783_v8, %v680_v3 }
 0x39f   :  { %v823_v10 = vmax.f32 %v789_v7, 0.0 }
 0x3a0   :  { %v822_v11 = vmax.f32 %v784_v9, 0.0  ;;  %v1161_v12 = vpop.f32.mrb[10].mxu1 }
 0x3a1   :  { %v799_v13 = vadd.f32 %v1161_v12, %v695_v4  ;;  %v793_v14 = vpop.f32.mrb[11].mxu1 }
 0x3a2   :  { %v1239_v16 = vpack.c.bf16 %v823_v10, %v822_v11  ;;  %v794_v17 = vadd.f32 %v793_v14, %v690_v6 }
 0x3a3   :  { %v825_v19 = vmax.f32 %v799_v13, 0.0 }
 0x3a4   :  { %v824_v20 = vmax.f32 %v794_v17, 0.0  ;;  %v1164_v21 = vpop.f32.mrb[12].mxu1  ;;  %1240 = vmatprep.subr.bf16.mxu0 %v1239_v16 }
 0x3a5   :  { %v809_v22 = vadd.f32 %v1164_v21, %v705_v15  ;;  %v803_v23 = vpop.f32.mrb[13].mxu1  ;;  %1242 = vmatpush3.bf16.msra.mxu0 %v1239_v16 }
 0x3a6   :  { %v1243_v24 = vpack.c.bf16 %v825_v19, %v824_v20  ;;  %v804_v25 = vadd.f32 %v803_v23, %v700_v18 }
 0x3a7   :  { %v827_v26 = vmax.f32 %v809_v22, 0.0 }
 0x3a8   :  { %v826_v28 = vmax.f32 %v804_v25, 0.0  ;;  %v1167_v29 = vpop.f32.mrb[14].mxu1  ;;  %1244 = vmatprep.subr.bf16.mxu0 %v1243_v24 }
 0x3a9   :  { %v819_v31 = vadd.f32 %v1167_v29, %v715_v27  ;;  %v813_v32 = vpop.f32.mrb[15].mxu1  ;;  %1246 = vmatpush3.bf16.msra.mxu0 %v1243_v24 }
 0x3aa   :  { %v1247_v33 = vpack.c.bf16 %v827_v26, %v826_v28  ;;  %v814_v34 = vadd.f32 %v813_v32, %v710_v30 }
 0x3ab   :  { %v829_v35 = vmax.f32 %v819_v31, 0.0 }
 0x3ac   :  { %v828_v36 = vmax.f32 %v814_v34, 0.0  ;;  %1248 = vmatprep.subr.bf16.mxu0 %v1247_v33 }
 0x3ad   :  { %1250 = vmatpush3.bf16.msra.mxu0 %v1247_v33 }
 0x3ae   :  { %v1251_v37 = vpack.c.bf16 %v829_v35, %v828_v36 }
 0x3b0   :  { %1252 = vmatprep.subr.bf16.mxu0 %v1251_v37 }
 0x3b1   :  { %1254 = vmatpush3.bf16.msra.mxu0 %v1251_v37 }
 0x3b4   :  { %1185 = vmatmul.mubr.msk.f32.vlgmr.msra.gmra.mrb[18].mxu0 %vm451_vm2, %v831_v38 }
 0x487   :  { %v1186_v41 = vpop.f32.mrb[18].mxu0 }
 0x488   :  { %v922_v42 = vadd.f32 %v1186_v41, %v842_v39  ;;  %v916_v43 = vpop.f32.mrb[19].mxu0 }
 0x489   :  { %v917_v44 = vadd.f32 %v916_v43, %v837_v40 }
 0x48a   :  { %v926_v45 = vmax.f32 %v922_v42, 0.0 }
 0x48b   :  { %v925_v47 = vmax.f32 %v917_v44, 0.0 }
 0x48c   :  { %v940_v49 = vmul.f32 %v937_v46, %v926_v45 }
 0x48d   :  { %v939_v50 = vmul.f32 %v932_v48, %v925_v47 }
 0x48f   :  { %v941_v52 = vadd.f32 %v940_v49, %v939_v50 }
 0x491   :  { %v942_v53 = vrot.slane %v941_v52, 4 }
 0x493   :  { %v943_v55 = vadd.f32 %v942_v53, %v941_v52 }
 0x495   :  { %v944_v56 = vrot.slane %v943_v55, 2 }
 0x497   :  { %v945_v58 = vadd.f32 %v944_v56, %v943_v55 }
 0x499   :  { %v946_v60 = vrot.slane %v945_v58, 1 }
 0x49b   :  { %v947_v62 = vadd.f32 %v946_v60, %v945_v58 }
 0x49d   :  { %v958_v63 = vadd.f32 %v957_v61, %v947_v62 }
 0x49f   :  { %959 = vst [vmem:[%s1601_s13] sm:$0x1] %v958_v63 }

</bundles_post_ra>
